<compile_context>
chip_gen: v5e
topology: v5e:2x2
jax: 0.10.0
libtpu: 0.0.40
codegen_flags: <defaults>
</compile_context>

<pallas_src>
import math

import jax
import jax.numpy as jnp
from jax.experimental import pallas as pl
from jax.experimental.pallas import tpu as pltpu

_LANE = 128
# ~2 MiB per block: ~85%+ of HBM roofline, and 2x(in)+2x(out) buffers = ~8 MiB
# fits every generation's default scoped-VMEM limit (v5e 16 MiB, v6e/v7x 32 MiB).
_TARGET_BLOCK_BYTES = 2 * 1024 * 1024
# Only truly small inputs take the single un-gridded invocation.
_SINGLE_CALL_MAX_BYTES = 512 * 1024

_INV_SQRT2 = 1.0 / math.sqrt(2.0)


def _gelu_kernel(x_ref, o_ref):
    """Exact erf-based GELU: x * 0.5 * (1 + erf(x / sqrt(2)))."""
    x = x_ref[...].astype(jnp.float32)          # compute in f32 for accuracy
    y = x * 0.5 * (1.0 + jax.lax.erf(x * _INV_SQRT2))
    o_ref[...] = y.astype(o_ref.dtype)


def _round_up(v, m):
    return -(-v // m) * m


def _round_down(v, m):
    return (v // m) * m


def gelu_pallas(x):
    """Elementwise erf-GELU via Pallas for arbitrary shapes, with no padding copies."""
    orig_shape, dtype = x.shape, x.dtype
    n = x.size
    if n == 0:
        return x                                 # degenerate: nothing to do

    itemsize = jnp.dtype(dtype).itemsize
    sublane = max(8, 32 // itemsize)             # 8 (f32), 16 (bf16), 32 (i8)

    # ---- zero-copy 2-D view of the input ------------------------------------
    if n % _LANE == 0:
        # lane-dense flat slab: every output store is a full-width unmasked vst
        lanes = _LANE
    else:
        # collapse leading dims; last dim stays the FULL array dim, so the
        # (8,128) tiling rule is satisfied with no pad/concat/slice copies.
        # The ragged lane tail gets masked stores - far cheaper than an extra
        # HBM pass for padding.
        lanes = orig_shape[-1] if x.ndim >= 1 else 1
    rows = n // lanes
    x2 = x.reshape(rows, lanes)                  # pure reshape: no data movement

    cost = pl.CostEstimate(flops=4 * n, transcendentals=n,
                           bytes_accessed=2 * n * itemsize)

    if n * itemsize <= _SINGLE_CALL_MAX_BYTES:
        # Small input: whole slab resident in VMEM, single un-gridded invocation.
        out2 = pl.pallas_call(
            _gelu_kernel,
            out_shape=jax.ShapeDtypeStruct((rows, lanes), dtype),
            cost_estimate=cost,
        )(x2)
    else:
        # Large input: tiled, software-pipelined, parallel grid.
        if lanes * sublane * itemsize <= _TARGET_BLOCK_BYTES:
            block_lanes = lanes                  # full (possibly ragged) last dim
        else:
            # a single row group is already too big: tile the lane dim too
            # (multiple of 128; Pallas masks the ragged final lane block)
            block_lanes = max(
                _LANE,
                _round_down(_TARGET_BLOCK_BYTES // (sublane * itemsize), _LANE))
        block_rows = _round_down(
            _TARGET_BLOCK_BYTES // (block_lanes * itemsize), sublane)
        block_rows = max(sublane, min(block_rows, _round_up(rows, sublane)))

        grid = (pl.cdiv(rows, block_rows), pl.cdiv(lanes, block_lanes))
        out2 = pl.pallas_call(
            _gelu_kernel,
            out_shape=jax.ShapeDtypeStruct((rows, lanes), dtype),
            grid=grid,
            in_specs=[pl.BlockSpec((block_rows, block_lanes),
                                   lambda i, j: (i, j))],
            out_specs=pl.BlockSpec((block_rows, block_lanes),
                                   lambda i, j: (i, j)),
            compiler_params=pltpu.CompilerParams(
                dimension_semantics=("parallel", "parallel")),
            cost_estimate=cost,
        )(x2)

    return out2.reshape(orig_shape)


# ------------------------- pure-JAX reference ---------------------------------
def gelu_ref(x):
    xf = x.astype(jnp.float32)
    return (xf * 0.5 * (1.0 + jax.lax.erf(xf / jnp.sqrt(jnp.float32(2.0))))
            ).astype(x.dtype)


# ----------------------------------- main --------------------------------------
if __name__ == "__main__":
    key = jax.random.PRNGKey(0)
    k1, k2, k3 = jax.random.split(key, 3)

    # small shape consistent with the module's context (batch=2, seq=8, hidden=32)
    x_small = jax.random.normal(k1, (2, 8, 32), jnp.float32)
    y_small = jax.block_until_ready(gelu_pallas(x_small))
    assert y_small.shape == x_small.shape
    assert jnp.allclose(y_small, gelu_ref(x_small), atol=1e-5, rtol=1e-5), \
        "small-shape mismatch vs JAX reference"

    # non-128-divisible shape: exercises the zero-copy collapsed (rows, last_dim)
    # gridded path with a ragged lane tail (masked stores, no padding copies)
    x_ragged = jax.random.normal(k2, (3, 1000, 173), jnp.float32)
    y_ragged = jax.block_until_ready(gelu_pallas(x_ragged))
    assert y_ragged.shape == x_ragged.shape
    assert jnp.allclose(y_ragged, gelu_ref(x_ragged), atol=1e-5, rtol=1e-5), \
        "ragged-shape mismatch vs JAX reference"

    # 128-divisible larger shape: exercises the lane-dense (rows, 128) gridded path
    x_big = jax.random.normal(k3, (4, 512, 768), jnp.float32)
    y_big = jax.block_until_ready(gelu_pallas(x_big))
    assert y_big.shape == x_big.shape
    assert jnp.allclose(y_big, gelu_ref(x_big), atol=1e-5, rtol=1e-5), \
        "large-shape mismatch vs JAX reference"

    print("KERNEL_OK")
</pallas_src>

<mosaic_0001>
module attributes {stable_mosaic.version = 11 : i64} {
  func.func @_gelu_kernel(%arg0: memref<4x128xf32, #tpu.memory_space<vmem>>, %arg1: memref<4x128xf32, #tpu.memory_space<vmem>>) attributes {dimension_semantics = [], scalar_prefetch = 0 : i64, scratch_operands = 0 : i64, tpu.core_type = #tpu.core_type<tc>} {
    %c0 = arith.constant 0 : index
    %c0_0 = arith.constant 0 : index
    %0 = vector.load %arg0[%c0, %c0_0] : memref<4x128xf32, #tpu.memory_space<vmem>>, vector<4x128xf32>
    %cst = arith.constant 5.000000e-01 : f32
    %1 = vector.broadcast %cst : f32 to vector<4x128xf32>
    %2 = arith.mulf %0, %1 : vector<4x128xf32>
    %cst_1 = arith.constant 0.707106769 : f32
    %3 = vector.broadcast %cst_1 : f32 to vector<4x128xf32>
    %4 = arith.mulf %0, %3 : vector<4x128xf32>
    %5 = math.erf %4 : vector<4x128xf32>
    %cst_2 = arith.constant 1.000000e+00 : f32
    %6 = vector.broadcast %cst_2 : f32 to vector<4x128xf32>
    %7 = arith.addf %6, %5 : vector<4x128xf32>
    %8 = arith.mulf %2, %7 : vector<4x128xf32>
    %c0_3 = arith.constant 0 : index
    %c0_4 = arith.constant 0 : index
    %9 = vector.load %arg1[%c0_3, %c0_4] : memref<4x128xf32, #tpu.memory_space<vmem>>, vector<4x128xf32>
    tpu.vector_store %arg1[%c0_3, %c0_4], %8 {strides = array<i32>} : memref<4x128xf32, #tpu.memory_space<vmem>>, vector<4x128xf32>,
    return
  }
}

</mosaic_0001>

<bundles_post_ra>
// kernel: tpu_custom_call.1
= control target key start
LH: loop header
LB: loop body
LE: loop exit
PB: predicated region body
PF: predicated region fallthrough
CT: control target
= control target key end

     0   :  { %6 = vsyncpa [#allocation3], 0  ;;  %s161_s0 = inlined_call_operand.hbm [shape: f32[4,128], index: 0, kind: input, shape index: {}]   ;;  %s162_s1 = inlined_call_operand.hbm [shape: f32[4,128], index: 1, kind: output, shape index: {}]  }
   0x1   :  { %7 = vsyncpa [#allocation4], 0  ;;  %s13_s8 = sshll.u32 %s161_s0, 4  ;;  %s143_s9 = smov [#allocation2]   ;;  %s14_s8 = int_to_ptr.hbm [resolvable:$true] %s13_s8 }
   0x2   :  { %s15_s10 = sshll.u32 %s143_s9, 4  ;;  %s16_s10 = int_to_ptr.vmem [resolvable:$true] %s15_s10 }
   0x3   :  { %18 = dma.hbm_to_vmem [thread:$0]  %s14_s8, 64, %s16_s10, [#allocation3]  }
   0x4   :  { %139 = dma.done.wait [#allocation3], 64  }
   0x5   :  { %140 = vsyncadd [#allocation3], 4294967232  ;;  %v23_v0 = vld [vmem:[#allocation2] sm:$0xf]  ;;  %s144_s0 = smov [#allocation5]   ;;  %s76_s14 = sshll.u32 %s162_s1, 4  ;;  %s77_s14 = int_to_ptr.hbm [resolvable:$true] %s76_s14 }
   0x6   :  { %v25_v1 = vmul.f32 0.70710677, %v23_v0  ;;  %v24_v36 = vmul.f32 0.5, %v23_v0  ;;  %s74_s11 = sshll.u32 %s144_s0, 4  ;;  %s75_s11 = int_to_ptr.vmem [resolvable:$true] %s74_s11 }
   0x8   :  { %v26_v2 = vmul.f32 %v25_v1, %v25_v1 }
   0xa   :  { %v27_v3 = vmin.f32 %v26_v2, 16.0 }
   0xc   :  { %v28_v4 = vmul.f32 2.1237322e-06, %v27_v3  ;;  %v39_v5 = vmul.f32 3.8918573e-05, %v27_v3 }
   0xe   :  { %v29_v6 = vadd.f32 0.00028619796, %v28_v4  ;;  %v40_v7 = vadd.f32 0.001143296, %v39_v5 }
  0x10   :  { %v30_v8 = vmul.f32 %v29_v6, %v27_v3  ;;  %v41_v9 = vmul.f32 %v40_v7, %v27_v3 }
  0x12   :  { %v31_v10 = vadd.f32 0.0036580483, %v30_v8  ;;  %v42_v11 = vadd.f32 0.014752088, %v41_v9 }
  0x14   :  { %v32_v12 = vmul.f32 %v31_v10, %v27_v3  ;;  %v43_v13 = vmul.f32 %v42_v11, %v27_v3 }
  0x16   :  { %v44_v14 = vadd.f32 0.112945676, %v43_v13  ;;  %v33_v15 = vadd.f32 0.05243302, %v32_v12 }
  0x18   :  { %v45_v16 = vmul.f32 %v44_v14, %v27_v3  ;;  %v34_v18 = vmul.f32 %v33_v15, %v27_v3 }
  0x1a   :  { %v46_v17 = vadd.f32 0.4994258, %v45_v16  ;;  %v35_v21 = vadd.f32 0.18741608, %v34_v18 }
  0x1c   :  { %v47_v19 = vmul.f32 %v46_v17, %v27_v3  ;;  %v36_v22 = vmul.f32 %v35_v21, %v27_v3 }
  0x1e   :  { %v48_v20 = vadd.f32 1.0, %v47_v19  ;;  %v37_v25 = vadd.f32 1.1283791, %v36_v22 }
  0x20   :  { %89 = vrcp.f32 %v48_v20  ;;  %v60_v26 = vand.u32 2147483648, %v48_v20  ;;  %vm54_vm0 = vweird.f32 %v48_v20  ;;  %v58_v28 = vand.u32 2147483647, %v48_v20 }
  0x21   :  { %v38_v31 = vmul.f32 %v37_v25, %v25_v1 }
  0x22   :  { %v61_v30 = vor.u32 1.1754944e-38, %v60_v26  ;;  %vm59_vm3 = vcmp.eq.f32.partialorder %v58_v28, 8.507059e+37 }
  0x26   :  { %v90_v23 = vpop.eup %89 }
  0x27   :  { %v50_v24 = vmul.f32 %v90_v23, %v48_v20  ;;  %vm55_vm1 = vweird.f32 %v90_v23 }
  0x28   :  { %vm56_vm2 = vmor %vm54_vm0, %vm55_vm1 }
  0x29   :  { %v51_v27 = vsub.f32 1.0, %v50_v24 }
  0x2b   :  { %v52_v29 = vmul.f32 %v90_v23, %v51_v27 }
  0x2d   :  { %v53_v32 = vadd.f32 %v90_v23, %v52_v29 }
  0x2f   :  { %v57_v33 = vsel %vm56_vm2, %v90_v23, %v53_v32 }
  0x30   :  { %v62_v34 = vsel %vm59_vm3, %v61_v30, %v57_v33 }
  0x31   :  { %v63_v35 = vmul.f32 %v62_v34, %v38_v31 }
  0x33   :  { %v86_v37 = vclamps-f32 %v63_v35, 1.0 }
  0x35   :  { %v66_v38 = vadd.f32 1.0, %v86_v37 }
  0x37   :  { %v67_v39 = vmul.f32 %v66_v38, %v24_v36 }
  0x39   :  { %68 = vst [vmem:[#allocation5] sm:$0xf] %v67_v39 }
  0x3a   :  { %79 = dma.vmem_to_hbm [thread:$0]  %s75_s11, 64, %s77_s14, [#allocation4]  }
  0x3b   :  { %141 = dma.done.wait [#allocation4], 64  }
  0x3c   :  { %142 = vsyncadd [#allocation4], 4294967232 }
  0x3d   :  { %84 = vsyncpa [#allocation3], 1 }
  0x3e   :  { %85 = vsyncpa [#allocation4], 1 }

</bundles_post_ra>
